<compile_context>
chip_gen: v7x
topology: tpu7x:2x2x1
jax: 0.10.0
libtpu: 0.0.40
codegen_flags: <defaults>
</compile_context>

<pallas_src>
import jax
import jax.numpy as jnp
from jax.experimental import pallas as pl
from jax.experimental.pallas import tpu as pltpu


def _round_up(x: int, m: int) -> int:
    return ((x + m - 1) // m) * m


def _fused_mlp_kernel(z_ref, w1_ref, b1_ref, w2_ref, b2_ref, w3_ref, b3_ref,
                      o_ref):
    """Both decoder heads fused: relu(relu(z@W1+b1)@W2+b2)@W3+b3.

    W1 = [W1_mean | W1_std], W2/W3 block-diagonal, so columns [:hid] carry the
    mean head and columns [hid:] carry the std head through all three layers.
    Inputs/weights are bf16; accumulation and bias/ReLU math are f32.
    """
    h = jnp.dot(z_ref[...], w1_ref[...], preferred_element_type=jnp.float32)
    h = jnp.maximum(h + b1_ref[...], 0.0).astype(w2_ref.dtype)

    h = jnp.dot(h, w2_ref[...], preferred_element_type=jnp.float32)
    h = jnp.maximum(h + b2_ref[...], 0.0).astype(w3_ref.dtype)

    out = jnp.dot(h, w3_ref[...], preferred_element_type=jnp.float32)
    o_ref[...] = (out + b3_ref[...]).astype(o_ref.dtype)


def _block_diag(a, b):
    """Block-diagonal concat of two (in, out) weight matrices."""
    top = jnp.concatenate([a, jnp.zeros((a.shape[0], b.shape[1]), a.dtype)], axis=1)
    bot = jnp.concatenate([jnp.zeros((b.shape[0], a.shape[1]), b.dtype), b], axis=1)
    return jnp.concatenate([top, bot], axis=0)


def _pick_block_rows(B: int, *, max_rows: int = 4096, split_threshold: int = 512) -> int:
    """Batch tile size.

    Small B: one grid step (tile == B).  Large B: at least 2 steps (so both
    v7x TensorCores get work), capped at 4096 rows to bound VMEM.
    """
    if B <= split_threshold:
        return B
    return min(max_rows, _round_up(pl.cdiv(B, 2), 8))


def _fused_mlp(z_flat, fused_params, out_dim):
    """Run the fused two-head MLP in one pallas_call, tiled over batch."""
    w1, b1, w2, b2, w3, b3 = fused_params
    B, inp_dim = z_flat.shape

    bm = _pick_block_rows(B)
    n_blocks = pl.cdiv(B, bm)

    full2d = lambda arr: pl.BlockSpec(arr.shape, lambda i: (0, 0))

    # Advisory only; slightly overstates work (counts block-diagonal zero MACs).
    flops = 2 * B * (inp_dim * w1.shape[1]
                     + w2.shape[0] * w2.shape[1]
                     + w3.shape[0] * w3.shape[1])
    bytes_accessed = (sum(int(a.size) * a.dtype.itemsize
                          for a in (z_flat, w1, b1, w2, b2, w3, b3))
                      + B * out_dim * 4)

    return pl.pallas_call(
        _fused_mlp_kernel,
        out_shape=jax.ShapeDtypeStruct((B, out_dim), jnp.float32),
        grid=(n_blocks,),
        in_specs=[
            pl.BlockSpec((bm, inp_dim), lambda i: (i, 0)),
            full2d(w1), full2d(b1),
            full2d(w2), full2d(b2),
            full2d(w3), full2d(b3),
        ],
        out_specs=pl.BlockSpec((bm, out_dim), lambda i: (i, 0)),
        compiler_params=pltpu.CompilerParams(
            dimension_semantics=("parallel",),
            # Explicit budget: ~10 MiB needed at bm=4096 (bf16 z + f32 out,
            # double-buffered, plus f32 (bm,128) intermediates). Portable to
            # v7x's 64 MiB physical / 32 MiB scoped default.
            vmem_limit_bytes=32 * 1024 * 1024),
        cost_estimate=pl.CostEstimate(
            flops=flops, transcendentals=0, bytes_accessed=bytes_accessed),
    )(z_flat, w1, b1, w2, b2, w3, b3)


class ObsNormDecoderPallas:
    """JAX/Pallas port of ObsNormDecoder (mean_dec + std_dec MLP heads)."""

    def __init__(self, obs_shape: int, z_channels: int, z_height: int = 4,
                 conditional: bool = False, hid: int = 64, key=None):
        self.obs_shape = obs_shape
        self.z_channels = z_channels
        self.z_height = z_height
        self.conditional = conditional
        self.hid = hid

        inp_dim = z_channels * z_height * z_height
        if conditional:
            inp_dim += 2
        self.inp_dim = inp_dim
        # Pad the contraction dim to a multiple of 8 (e.g. 66 -> 72 in the
        # conditional case) so the z-tile DMA rows stay aligned.
        self.inp_dim_padded = max(_round_up(inp_dim, 8), 8)

        if key is None:
            key = jax.random.PRNGKey(0)

        def init_linear(k, fan_in, fan_out):
            # Deterministic init mimicking PyTorch's uniform(-1/sqrt(fan_in), ...)
            kw, kb = jax.random.split(k)
            bound = 1.0 / jnp.sqrt(fan_in)
            w = jax.random.uniform(kw, (fan_in, fan_out), jnp.float32, -bound, bound)
            # biases kept 2D (1, fan_out) for TPU-friendly layout
            b = jax.random.uniform(kb, (1, fan_out), jnp.float32, -bound, bound)
            return w, b

        keys = jax.random.split(key, 6)
        dims = [(inp_dim, hid), (hid, hid), (hid, obs_shape)]

        mean_params, std_params = [], []
        for i, (fi, fo) in enumerate(dims):
            wm, bm = init_linear(keys[i], fi, fo)
            ws, bs = init_linear(keys[3 + i], fi, fo)
            mean_params += [wm, bm]
            std_params += [ws, bs]
        self.mean_params = tuple(mean_params)   # f32, unfused (reference)
        self.std_params = tuple(std_params)     # f32, unfused (reference)

        # --- Fuse the two heads into one 3-layer MLP (done once at init) ---
        w1m, b1m, w2m, b2m, w3m, b3m = self.mean_params
        w1s, b1s, w2s, b2s, w3s, b3s = self.std_params

        w1 = jnp.concatenate([w1m, w1s], axis=1)              # (inp_dim, 2*hid)
        if self.inp_dim_padded > inp_dim:
            pad = self.inp_dim_padded - inp_dim
            w1 = jnp.concatenate(
                [w1, jnp.zeros((pad, w1.shape[1]), w1.dtype)], axis=0)

        self.fused_params = (
            w1.astype(jnp.bfloat16),                           # (inp_pad, 2*hid)
            jnp.concatenate([b1m, b1s], axis=1),               # (1, 2*hid) f32
            _block_diag(w2m, w2s).astype(jnp.bfloat16),        # (2*hid, 2*hid)
            jnp.concatenate([b2m, b2s], axis=1),               # (1, 2*hid) f32
            _block_diag(w3m, w3s).astype(jnp.bfloat16),        # (2*hid, 2*obs)
            jnp.concatenate([b3m, b3s], axis=1),               # (1, 2*obs) f32
        )

    def __call__(self, z, y=None):
        # glue: flatten (B, C, H, W) -> (B, C*H*W), row-major == torch .view
        B = z.shape[0]
        z_flat = jnp.reshape(
            z, (B, self.z_channels * self.z_height * self.z_height))
        z_flat = z_flat.astype(jnp.float32)
        if self.conditional:
            z_flat = jnp.concatenate([z_flat, y.astype(jnp.float32)], axis=-1)
        if self.inp_dim_padded > self.inp_dim:
            pad = self.inp_dim_padded - self.inp_dim
            z_flat = jnp.concatenate(
                [z_flat, jnp.zeros((B, pad), jnp.float32)], axis=-1)
        # Narrow the HBM stream: bf16 inputs, f32 accumulation in-kernel.
        z_bf16 = z_flat.astype(jnp.bfloat16)

        fused = _fused_mlp(z_bf16, self.fused_params, 2 * self.obs_shape)
        mean = fused[:, :self.obs_shape]
        logstd = fused[:, self.obs_shape:]
        return {
            'obs_normalizer.obs_rms.mean': mean,
            'obs_normalizer.obs_rms.logstd': logstd,
        }


def _reference_forward(decoder: ObsNormDecoderPallas, z, y=None):
    """Plain-JAX reference using the UNFUSED per-head params.

    Mirrors the kernel's numerics (bf16 operands, f32 accumulation) so the
    comparison stays tight.
    """
    B = z.shape[0]
    x = jnp.reshape(z, (B, -1)).astype(jnp.float32)
    if decoder.conditional:
        x = jnp.concatenate([x, y.astype(jnp.float32)], axis=-1)
    x = x.astype(jnp.bfloat16)

    def mlp(x, p):
        w1, b1, w2, b2, w3, b3 = p
        h = jnp.dot(x, w1.astype(jnp.bfloat16),
                    preferred_element_type=jnp.float32) + b1
        h = jnp.maximum(h, 0.0).astype(jnp.bfloat16)
        h = jnp.dot(h, w2.astype(jnp.bfloat16),
                    preferred_element_type=jnp.float32) + b2
        h = jnp.maximum(h, 0.0).astype(jnp.bfloat16)
        return jnp.dot(h, w3.astype(jnp.bfloat16),
                       preferred_element_type=jnp.float32) + b3

    return mlp(x, decoder.mean_params), mlp(x, decoder.std_params)


if __name__ == "__main__":
    key = jax.random.PRNGKey(0)
    k_param, k_z = jax.random.split(key)

    # Small shapes consistent with the module: batch=2, z_channels=4, z_height=4
    # -> inp_dim = 64, hid = 64, obs_shape = 32.
    B, C, H = 2, 4, 4
    obs_shape = 32
    decoder = ObsNormDecoderPallas(obs_shape=obs_shape, z_channels=C,
                                   z_height=H, conditional=False, hid=64,
                                   key=k_param)

    z = jax.random.normal(k_z, (B, C, H, H), dtype=jnp.float32)

    out = decoder(z)
    mean = jax.block_until_ready(out['obs_normalizer.obs_rms.mean'])
    logstd = jax.block_until_ready(out['obs_normalizer.obs_rms.logstd'])

    # sanity check against plain-JAX reference (unfused heads, same bf16 casts)
    ref_mean, ref_std = _reference_forward(decoder, z)
    assert mean.shape == (B, obs_shape) and logstd.shape == (B, obs_shape)
    assert jnp.allclose(mean, ref_mean, atol=2e-3, rtol=2e-3)
    assert jnp.allclose(logstd, ref_std, atol=2e-3, rtol=2e-3)

    print("KERNEL_OK")
</pallas_src>

<mosaic_0001>
module attributes {stable_mosaic.version = 11 : i64} {
  func.func @_fused_mlp_kernel(%arg0: i32, %arg1: memref<2x64xbf16, #tpu.memory_space<vmem>>, %arg2: memref<64x128xbf16, #tpu.memory_space<vmem>>, %arg3: memref<1x128xf32, #tpu.memory_space<vmem>>, %arg4: memref<128x128xbf16, #tpu.memory_space<vmem>>, %arg5: memref<1x128xf32, #tpu.memory_space<vmem>>, %arg6: memref<128x64xbf16, #tpu.memory_space<vmem>>, %arg7: memref<1x64xf32, #tpu.memory_space<vmem>>, %arg8: memref<2x64xf32, #tpu.memory_space<vmem>>) attributes {dimension_semantics = [#tpu.dimension_semantics<parallel>], iteration_bounds = array<i64: 1>, scalar_prefetch = 0 : i64, scratch_operands = 0 : i64, tpu.core_type = #tpu.core_type<tc>, window_params = [{transform_indices = @transform_0, window_bounds = array<i64: 2, 64>}, {pipeline_mode = #tpu.pipeline_mode<synchronous>, transform_indices = @transform_1, window_bounds = array<i64: 64, 128>}, {pipeline_mode = #tpu.pipeline_mode<synchronous>, transform_indices = @transform_2, window_bounds = array<i64: 1, 128>}, {pipeline_mode = #tpu.pipeline_mode<synchronous>, transform_indices = @transform_3, window_bounds = array<i64: 128, 128>}, {pipeline_mode = #tpu.pipeline_mode<synchronous>, transform_indices = @transform_4, window_bounds = array<i64: 1, 128>}, {pipeline_mode = #tpu.pipeline_mode<synchronous>, transform_indices = @transform_5, window_bounds = array<i64: 128, 64>}, {pipeline_mode = #tpu.pipeline_mode<synchronous>, transform_indices = @transform_6, window_bounds = array<i64: 1, 64>}, {transform_indices = @transform_7, window_bounds = array<i64: 2, 64>}]} {
    %c0 = arith.constant 0 : index
    %c0_0 = arith.constant 0 : index
    %0 = vector.load %arg1[%c0, %c0_0] : memref<2x64xbf16, #tpu.memory_space<vmem>>, vector<2x64xbf16>
    %c0_1 = arith.constant 0 : index
    %c0_2 = arith.constant 0 : index
    %1 = vector.load %arg2[%c0_1, %c0_2] : memref<64x128xbf16, #tpu.memory_space<vmem>>, vector<64x128xbf16>
    %cst = arith.constant dense<0.000000e+00> : vector<2x128xf32>
    %2 = tpu.matmul %0, %1, %cst {dimension_numbers = #tpu.dot_dimension_numbers<[1], [0], [0], [1], [0, 0, 1, 1], [], []>} : vector<2x64xbf16>, vector<64x128xbf16>, vector<2x128xf32> -> vector<2x128xf32>
    %c0_3 = arith.constant 0 : index
    %c0_4 = arith.constant 0 : index
    %3 = vector.load %arg3[%c0_3, %c0_4] : memref<1x128xf32, #tpu.memory_space<vmem>>, vector<1x128xf32>
    %4 = vector.broadcast %3 : vector<1x128xf32> to vector<2x128xf32>
    %5 = arith.addf %2, %4 : vector<2x128xf32>
    %cst_5 = arith.constant 0.000000e+00 : f32
    %6 = vector.broadcast %cst_5 : f32 to vector<2x128xf32>
    %7 = arith.maximumf %5, %6 : vector<2x128xf32>
    %8 = arith.truncf %7 : vector<2x128xf32> to vector<2x128xbf16>
    %c0_6 = arith.constant 0 : index
    %c0_7 = arith.constant 0 : index
    %9 = vector.load %arg4[%c0_6, %c0_7] : memref<128x128xbf16, #tpu.memory_space<vmem>>, vector<128x128xbf16>
    %cst_8 = arith.constant dense<0.000000e+00> : vector<2x128xf32>
    %10 = tpu.matmul %8, %9, %cst_8 {dimension_numbers = #tpu.dot_dimension_numbers<[1], [0], [0], [1], [0, 0, 1, 1], [], []>} : vector<2x128xbf16>, vector<128x128xbf16>, vector<2x128xf32> -> vector<2x128xf32>
    %c0_9 = arith.constant 0 : index
    %c0_10 = arith.constant 0 : index
    %11 = vector.load %arg5[%c0_9, %c0_10] : memref<1x128xf32, #tpu.memory_space<vmem>>, vector<1x128xf32>
    %12 = vector.broadcast %11 : vector<1x128xf32> to vector<2x128xf32>
    %13 = arith.addf %10, %12 : vector<2x128xf32>
    %cst_11 = arith.constant 0.000000e+00 : f32
    %14 = vector.broadcast %cst_11 : f32 to vector<2x128xf32>
    %15 = arith.maximumf %13, %14 : vector<2x128xf32>
    %16 = arith.truncf %15 : vector<2x128xf32> to vector<2x128xbf16>
    %c0_12 = arith.constant 0 : index
    %c0_13 = arith.constant 0 : index
    %17 = vector.load %arg6[%c0_12, %c0_13] : memref<128x64xbf16, #tpu.memory_space<vmem>>, vector<128x64xbf16>
    %cst_14 = arith.constant dense<0.000000e+00> : vector<2x64xf32>
    %18 = tpu.matmul %16, %17, %cst_14 {dimension_numbers = #tpu.dot_dimension_numbers<[1], [0], [0], [1], [0, 0, 1, 1], [], []>} : vector<2x128xbf16>, vector<128x64xbf16>, vector<2x64xf32> -> vector<2x64xf32>
    %c0_15 = arith.constant 0 : index
    %c0_16 = arith.constant 0 : index
    %19 = vector.load %arg7[%c0_15, %c0_16] : memref<1x64xf32, #tpu.memory_space<vmem>>, vector<1x64xf32>
    %20 = vector.broadcast %19 : vector<1x64xf32> to vector<2x64xf32>
    %21 = arith.addf %18, %20 : vector<2x64xf32>
    %c0_17 = arith.constant 0 : index
    %c0_18 = arith.constant 0 : index
    %22 = vector.load %arg8[%c0_17, %c0_18] : memref<2x64xf32, #tpu.memory_space<vmem>>, vector<2x64xf32>
    tpu.vector_store %arg8[%c0_17, %c0_18], %21 {strides = array<i32>} : memref<2x64xf32, #tpu.memory_space<vmem>>, vector<2x64xf32>,
    return
  }
  func.func @transform_0(%arg0: i32) -> (i32, i32) {
    %c0_i32 = arith.constant 0 : i32
    %c0_i32_0 = arith.constant 0 : i32
    return %arg0, %c0_i32 : i32, i32
  }
  func.func @transform_1(%arg0: i32) -> (i32, i32) {
    %c0_i32 = arith.constant 0 : i32
    %c0_i32_0 = arith.constant 0 : i32
    %c0_i32_1 = arith.constant 0 : i32
    return %c0_i32, %c0_i32_0 : i32, i32
  }
  func.func @transform_2(%arg0: i32) -> (i32, i32) {
    %c0_i32 = arith.constant 0 : i32
    %c0_i32_0 = arith.constant 0 : i32
    %c0_i32_1 = arith.constant 0 : i32
    return %c0_i32, %c0_i32_0 : i32, i32
  }
  func.func @transform_3(%arg0: i32) -> (i32, i32) {
    %c0_i32 = arith.constant 0 : i32
    %c0_i32_0 = arith.constant 0 : i32
    %c0_i32_1 = arith.constant 0 : i32
    return %c0_i32, %c0_i32_0 : i32, i32
  }
  func.func @transform_4(%arg0: i32) -> (i32, i32) {
    %c0_i32 = arith.constant 0 : i32
    %c0_i32_0 = arith.constant 0 : i32
    %c0_i32_1 = arith.constant 0 : i32
    return %c0_i32, %c0_i32_0 : i32, i32
  }
  func.func @transform_5(%arg0: i32) -> (i32, i32) {
    %c0_i32 = arith.constant 0 : i32
    %c0_i32_0 = arith.constant 0 : i32
    %c0_i32_1 = arith.constant 0 : i32
    return %c0_i32, %c0_i32_0 : i32, i32
  }
  func.func @transform_6(%arg0: i32) -> (i32, i32) {
    %c0_i32 = arith.constant 0 : i32
    %c0_i32_0 = arith.constant 0 : i32
    %c0_i32_1 = arith.constant 0 : i32
    return %c0_i32, %c0_i32_0 : i32, i32
  }
  func.func @transform_7(%arg0: i32) -> (i32, i32) {
    %c0_i32 = arith.constant 0 : i32
    %c0_i32_0 = arith.constant 0 : i32
    return %arg0, %c0_i32 : i32, i32
  }
}

</mosaic_0001>

<bundles_post_ra>
// kernel: tpu_custom_call.1
= control target key start
LH: loop header
LB: loop body
LE: loop exit
PB: predicated region body
PF: predicated region fallthrough
CT: control target
= control target key end

     0   :  { %v500_v1 = vmov 0.0   ;;  %vm501_vm0 = vmmov 0   ;;  %vm68_vm1 = vcmask 523264   ;;  %s653_s0 = inlined_call_operand.vmem [shape: bf16[2,64], index: 0, kind: input, shape index: {}]   ;;  %s654_s1 = inlined_call_operand.vmem [shape: bf16[64,128], index: 1, kind: input, shape index: {}]   ;;  %s655_s2 = inlined_call_operand.vmem [shape: f32[1,128], index: 2, kind: input, shape index: {}]   ;;  %s656_s3 = inlined_call_operand.vmem [shape: bf16[128,128], index: 3, kind: input, shape index: {}]   ;;  %s657_s4 = inlined_call_operand.vmem [shape: f32[1,128], index: 4, kind: input, shape index: {}]   ;;  %s658_s5 = inlined_call_operand.vmem [shape: bf16[128,64], index: 5, kind: input, shape index: {}]   ;;  %s659_s6 = inlined_call_operand.vmem [shape: f32[1,64], index: 6, kind: input, shape index: {}]   ;;  %s660_s7 = inlined_call_operand.hbm [shape: f32[2,64], index: 7, kind: output, shape index: {}]  }
   0x1   :  { %v456_v0 = vld [vmem:[%s654_s1] sm:$0xff]   ;;  %401 = vmatprep.subr.bf16.mxu0 %v500_v1  ;;  %413 = vmatprep.subr.bf16.mxu1 %v500_v1  ;;  %v457_v2 = vld [vmem:[%s654_s1 + $0x8] sm:$0xff]   ;;  %v458_v4 = vld [vmem:[%s654_s1 + $0x10] sm:$0xff]  }
   0x2   :  { %402 = vmatpush3.bf16.msra.mxu0 %v456_v0  ;;  %409 = vmatprep.mubr.msk.bf16.mxu0 %vm501_vm0, %v500_v1  ;;  %v460_v3 = vld [vmem:[%s656_s3] sm:$0xff]   ;;  %v461_v5 = vld [vmem:[%s656_s3 + $0x8] sm:$0xff]   ;;  %v459_v6 = vld [vmem:[%s654_s1 + $0x18] sm:$0xff]  }
   0x3   :  { %403 = vmatprep.subr.bf16.mxu0 %v500_v1  ;;  %429 = vmatprep.mubr.msk.bf16.mxu1 %vm501_vm0, %v500_v1  ;;  %v462_v7 = vld [vmem:[%s656_s3 + $0x10] sm:$0xff]   ;;  %v28_v8 = vld [vmem:[%s653_s0] sm:$0x1]  ;;  %v463_v9 = vld [vmem:[%s656_s3 + $0x18] sm:$0xff]  }
   0x4   :  { %414 = vmatpush3.bf16.msra.mxu1 %v460_v3 }
   0x5   :  { %415 = vmatprep.subr.bf16.mxu1 %v500_v1 }
   0x6   :  { %404 = vmatpush3.bf16.msra.mxu0 %v457_v2 }
   0x7   :  { %405 = vmatprep.subr.bf16.mxu0 %v500_v1 }
   0x8   :  { %416 = vmatpush3.bf16.msra.mxu1 %v461_v5 }
   0x9   :  { %417 = vmatprep.subr.bf16.mxu1 %v500_v1 }
   0xa   :  { %406 = vmatpush3.bf16.msra.mxu0 %v458_v4 }
   0xb   :  { %407 = vmatprep.subr.bf16.mxu0 %v500_v1 }
   0xc   :  { %418 = vmatpush3.bf16.msra.mxu1 %v462_v7 }
   0xd   :  { %419 = vmatprep.subr.bf16.mxu1 %v500_v1 }
   0xe   :  { %408 = vmatpush3.bf16.msra.mxu0 %v459_v6 }
   0xf   :  { %433 = vmatprep.subr.bf16.mxu0 %v500_v1 }
  0x11   :  { %410 = vmatmul.mubr.msk.bf16.vlgmr.msra.gmra.mrb[0].mxu0 %vm68_vm1, %v28_v8 }
  0x12   :  { %12 = vsyncpa [#allocation3], 0  ;;  %449 = vmatprep.mubr.msk.bf16.mxu0 %vm501_vm0, %v500_v1  ;;  %420 = vmatpush3.bf16.msra.mxu1 %v463_v9  ;;  %v464_v10 = vld [vmem:[%s656_s3 + $0x20] sm:$0xff]   ;;  %v465_v11 = vld [vmem:[%s656_s3 + $0x28] sm:$0xff]   ;;  %s502_s20 = smov [#allocation2]   ;;  %vm338_vm2 = vcmask 517120  }
  0x13   :  { %421 = vmatprep.subr.bf16.mxu1 %v500_v1  ;;  %v466_v12 = vld [vmem:[%s656_s3 + $0x30] sm:$0xff]   ;;  %v467_v13 = vld [vmem:[%s656_s3 + $0x38] sm:$0xff]   ;;  %v468_v14 = vld [vmem:[%s658_s5] sm:$0xff]   ;;  %s346_s21 = sshll.u32 %s502_s20, 4  ;;  %s347_s21 = int_to_ptr.vmem [resolvable:$true] %s346_s21 }
  0x14   :  { %434 = vmatpush3.bf16.msra.mxu0 %v468_v14  ;;  %v469_v15 = vld [vmem:[%s658_s5 + $0x8] sm:$0xff]   ;;  %v470_v16 = vld [vmem:[%s658_s5 + $0x10] sm:$0xff]   ;;  %v471_v17 = vld [vmem:[%s658_s5 + $0x18] sm:$0xff]   ;;  %p481_p1 = scmp.lt.s32.totalorder %s347_s21, %s347_s21 }
  0x15   :  { %435 = vmatprep.subr.bf16.mxu0 %v500_v1  ;;  %v472_v18 = vld [vmem:[%s658_s5 + $0x20] sm:$0xff]   ;;  %v473_v19 = vld [vmem:[%s658_s5 + $0x28] sm:$0xff]   ;;  %v474_v28 = vld [vmem:[%s658_s5 + $0x30] sm:$0xff]  }
  0x16   :  { %422 = vmatpush3.bf16.msra.mxu1 %v464_v10  ;;  %v354_v20 = vld [vmem:[%s655_s2] ss:$0 sm:$0xff]  ;;  %v475_v29 = vld [vmem:[%s658_s5 + $0x38] sm:$0xff]  }
  0x17   :  { %423 = vmatprep.subr.bf16.mxu1 %v500_v1  ;;  %v360_v30 = vld [vmem:[%s657_s4] ss:$0 sm:$0xff]  ;;  %s476_s4 = scalar_lea.vmem %s347_s21, 32 }
  0x18   :  { %436 = vmatpush3.bf16.msra.mxu0 %v469_v15  ;;  %v369_v38 = vld [vmem:[%s659_s6] ss:$0 sm:$0xff]  ;;  %p477_p0 = scmp.ne.s32.totalorder %s347_s21, %s476_s4  ;;  %p482_p2 = scmp.lt.s32.totalorder %s476_s4, %s476_s4 }
  0x19   :  { %437 = vmatprep.subr.bf16.mxu0 %v500_v1 }
  0x1a   :  { %424 = vmatpush3.bf16.msra.mxu1 %v465_v11  ;;  %p483_p3 = por %p482_p2, %p481_p1 }
  0x1b   :  { %425 = vmatprep.subr.bf16.mxu1 %v500_v1 }
  0x1c   :  { %438 = vmatpush3.bf16.msra.mxu0 %v470_v16  ;;  %p484_p4 = pnand %p483_p3, %p477_p0 }
  0x1d   :  { %439 = vmatprep.subr.bf16.mxu0 %v500_v1 }
  0x1e   :  { %426 = vmatpush3.bf16.msra.mxu1 %v466_v12 }
  0x1f   :  { %427 = vmatprep.subr.bf16.mxu1 %v500_v1 }
  0x20   :  { %440 = vmatpush3.bf16.msra.mxu0 %v471_v17 }
  0x21   :  { %441 = vmatprep.subr.bf16.mxu0 %v500_v1 }
  0x22   :  { %428 = vmatpush3.bf16.msra.mxu1 %v467_v13 }
  0x24   :  { %442 = vmatpush3.bf16.msra.mxu0 %v472_v18 }
  0x25   :  { %443 = vmatprep.subr.bf16.mxu0 %v500_v1 }
  0x28   :  { %444 = vmatpush3.bf16.msra.mxu0 %v473_v19 }
  0x29   :  { %445 = vmatprep.subr.bf16.mxu0 %v500_v1 }
  0x2c   :  { %446 = vmatpush3.bf16.msra.mxu0 %v474_v28 }
  0x2d   :  { %447 = vmatprep.subr.bf16.mxu0 %v500_v1 }
  0x30   :  { %448 = vmatpush3.bf16.msra.mxu0 %v475_v29 }
  0xe4   :  { %v106_v21 = vpop.f32.mrb[0].mxu0 }
  0xe5   :  { %v107_v22 = vadd.f32 %v354_v20, %v106_v21  ;;  %v411_v23 = vpop.f32.mrb[1].mxu0 }
  0xe6   :  { %v109_v24 = vpop.f32.mrb[2].mxu0 }
  0xe7   :  { %v112_v25 = vmax.f32 %v107_v22, 0.0  ;;  %v412_v26 = vpop.f32.mrb[3].mxu0 }
  0xe9   :  { %v113_v27 = vpack.c.bf16 %v112_v25, %v112_v25 }
  0xeb   :  { %430 = vmatmul.mubr.bf16.vlgmr.msra.gmra.mrb[0].mxu1 %v113_v27 }
 0x1be   :  { %v219_v31 = vpop.f32.mrb[0].mxu1 }
 0x1bf   :  { %v220_v32 = vadd.f32 %v360_v30, %v219_v31  ;;  %v431_v33 = vpop.f32.mrb[1].mxu1 }
 0x1c0   :  { %v222_v34 = vpop.f32.mrb[2].mxu1 }
 0x1c1   :  { %v225_v35 = vmax.f32 %v220_v32, 0.0  ;;  %v432_v36 = vpop.f32.mrb[3].mxu1 }
 0x1c3   :  { %v226_v37 = vpack.c.bf16 %v225_v35, %v225_v35 }
 0x1c5   :  { %450 = vmatmul.mubr.bf16.vlgmr.msra.gmra.mrb[4].mxu0 %v226_v37 }
 0x298   :  { %v332_v39 = vpop.f32.mrb[4].mxu0 }
 0x299   :  { %v333_v40 = vadd.f32 %v369_v38, %v332_v39  ;;  %v451_v41 = vpop.f32.mrb[5].mxu0 }
 0x29a   :  { %v335_v42 = vpop.f32.mrb[6].mxu0 }
 0x29b   :  { %v452_v43 = vpop.f32.mrb[7].mxu0  ;;  %339 = vst.msk [vmem:[#allocation2] sm:$0x3] %vm338_vm2, %v333_v40 }
 0x29c   :  { %487 = shalt.err (!%p484_p4)
}
 0x29d   :  { %s488_s6 = scalar_lea.hbm %s660_s7, 32 }
 0x29e   :  { %p489_p5 = scmp.ne.s32.totalorder %s660_s7, %s488_s6  ;;  %p492_p6 = scmp.lt.u32.totalorder %s488_s6, %s660_s7 }
 0x2a0   :  { %p494_p7 = pnand %p492_p6, %p489_p5 }
 0x2a2   :  { %497 = shalt.err (!%p494_p7)
}
 0x2a3   :  { %349 = dma.vmem_to_hbm [thread:$0]  %s347_s21, 32, %s660_s7, [#allocation3]  }
 0x2a4   :  { %498 = dma.done.wait [#allocation3], 32  }
 0x2a5   :  { %499 = vsyncadd [#allocation3], 4294967264 }
 0x2a6   :  { %353 = vsyncpa [#allocation3], 1 }

</bundles_post_ra>
